<compile_context>
chip_gen: v7x
topology: tpu7x:2x2x1
jax: 0.10.0
libtpu: 0.0.40
codegen_flags: <defaults>
</compile_context>

<pallas_src>
import jax
import jax.numpy as jnp
from jax import lax
from jax.experimental import pallas as pl
from jax.experimental.pallas import tpu as pltpu


def _critic_head_kernel(x_ref, w1_ref, b1_ref, w2_ref, b2_ref, out_ref):
    """Fused value head: out[0, b] = relu(x[b] @ W1 + b1) . w2_row + b2.

    Shapes (per block):
      x_ref  : (TB, D)  VMEM
      w1_ref : (D, H)   VMEM   (transposed vs. PyTorch -> x @ W1 on the MXU)
      b1_ref : (1, H)   VMEM
      w2_ref : (1, H)   VMEM   (PyTorch layer-2 weight row, NOT transposed)
      b2_ref : (1,)     SMEM   (scalar bias)
      out_ref: (1, TB)  VMEM   (lane-dense: batch on the lane axis)
    """
    # Layer 1 on the MXU: f32 operands, f32 accumulate.
    h = jnp.dot(x_ref[...], w1_ref[...], preferred_element_type=jnp.float32)
    h = jnp.maximum(h + b1_ref[...], 0.0)                      # VPU: bias + ReLU

    # Layer 2: contract H with w2 as the LHS -> (1, TB).  The result is born
    # lane-dense (batch on lanes), so the final store is an unmasked full vst.
    v = lax.dot_general(
        w2_ref[...], h,
        dimension_numbers=(((1,), (1,)), ((), ())),             # (1,H)·(TB,H) over H
        preferred_element_type=jnp.float32,
    )                                                           # (1, TB)

    # Scalar bias from SMEM, broadcast on the VPU.
    out_ref[...] = (v + b2_ref[0]).astype(out_ref.dtype)


def critic_head_forward(x, w1, b1, w2, b2, *, block_b=256):
    """Pallas wrapper. x: (B, D) f32 -> values: (B,) f32.

    w1: (D, H)  (transposed vs. PyTorch weight (H, D))
    b1: (1, H)
    w2: (1, H)  (same layout as PyTorch weight (1, H))
    b2: (1,)
    """
    B, D = x.shape
    H = w1.shape[1]
    assert w1.shape == (D, H)
    assert b1.shape == (1, H)
    assert w2.shape == (1, H)
    assert b2.shape == (1,)

    cost = pl.CostEstimate(
        flops=2 * B * D * H + 2 * B * H,
        transcendentals=0,
        bytes_accessed=4 * (B * D + D * H + 2 * H + 1 + B),
    )

    if B <= block_b:
        # Small B: grid-free, single VMEM-resident block. Pure launch-latency
        # kernel; skipping grid machinery / double-buffer bookkeeping is the
        # fastest structure here.
        out = pl.pallas_call(
            _critic_head_kernel,
            out_shape=jax.ShapeDtypeStruct((1, B), jnp.float32),
            in_specs=[
                pl.BlockSpec(memory_space=pltpu.MemorySpace.VMEM),  # x
                pl.BlockSpec(memory_space=pltpu.MemorySpace.VMEM),  # w1
                pl.BlockSpec(memory_space=pltpu.MemorySpace.VMEM),  # b1
                pl.BlockSpec(memory_space=pltpu.MemorySpace.VMEM),  # w2 row
                pl.BlockSpec(memory_space=pltpu.MemorySpace.SMEM),  # b2 scalar
            ],
            out_specs=pl.BlockSpec(memory_space=pltpu.MemorySpace.VMEM),
            cost_estimate=cost,
        )(x, w1, b1, w2, b2)
        return out[0]

    # Large B: grid over the batch axis. Weights use a constant block index so
    # they are DMA'd once and stay VMEM-resident across grid steps; the batch
    # axis is "parallel" so v7x's two TensorCores split it.
    nb = pl.cdiv(B, block_b)
    out = pl.pallas_call(
        _critic_head_kernel,
        out_shape=jax.ShapeDtypeStruct((1, B), jnp.float32),
        grid=(nb,),
        in_specs=[
            pl.BlockSpec((block_b, D), lambda i: (i, 0)),           # x tile
            pl.BlockSpec((D, H), lambda i: (0, 0)),                 # w1 (resident)
            pl.BlockSpec((1, H), lambda i: (0, 0)),                 # b1 (resident)
            pl.BlockSpec((1, H), lambda i: (0, 0)),                 # w2 (resident)
            pl.BlockSpec(memory_space=pltpu.MemorySpace.SMEM),      # b2 scalar
        ],
        out_specs=pl.BlockSpec((1, block_b), lambda i: (0, i)),     # lane-dense row
        cost_estimate=cost,
        compiler_params=pltpu.CompilerParams(
            dimension_semantics=("parallel",)),
    )(x, w1, b1, w2, b2)
    return out[0]


def _orthogonal(key, rows, cols, gain):
    """Deterministic orthogonal init (same spirit as nn.init.orthogonal_)."""
    # TODO(synk): not bit-identical to torch.nn.init.orthogonal_ (QR of an n x n
    # Gaussian, sliced) -- distributionally equivalent only.
    n = max(rows, cols)
    a = jax.random.normal(key, (n, n), dtype=jnp.float32)
    q, r = jnp.linalg.qr(a)
    d = jnp.diag(r)
    q = q * jnp.where(d >= 0, 1.0, -1.0)[None, :]
    return gain * q[:rows, :cols]


def make_params(key, rsa_output_dim=320, hidden_dim=64):
    """Parameters in the layouts the kernel consumes."""
    k1, k2 = jax.random.split(key)
    # Layer 1: orthogonal gain=1.0, bias=0; stored as (D, H) so the kernel does x @ W1.
    w1 = _orthogonal(k1, rsa_output_dim, hidden_dim, gain=1.0)   # (D, H)
    b1 = jnp.zeros((1, hidden_dim), dtype=jnp.float32)
    # Layer 2: orthogonal gain=0.1, bias=0; kept as the (1, H) row PyTorch uses.
    w2 = _orthogonal(k2, 1, hidden_dim, gain=0.1)                # (1, H)
    b2 = jnp.zeros((1,), dtype=jnp.float32)
    return w1, b1, w2, b2


if __name__ == "__main__":
    key = jax.random.PRNGKey(0)
    k_in, k_big, k_params = jax.random.split(key, 3)

    RSA_DIM = 320   # 2D = 320 as in the module
    HIDDEN = 64

    w1, b1, w2, b2 = make_params(k_params, RSA_DIM, HIDDEN)

    def reference(xx):
        return jnp.maximum(xx @ w1 + b1, 0.0) @ w2[0] + b2[0]

    # --- small-batch (grid-free) path ---
    B = 8
    x = jax.random.normal(k_in, (B, RSA_DIM), dtype=jnp.float32)
    values = jax.block_until_ready(critic_head_forward(x, w1, b1, w2, b2))
    assert values.shape == (B,)
    assert jnp.allclose(values, reference(x), atol=1e-3, rtol=1e-3)

    # --- large-batch (gridded, weights-resident, parallel-over-B) path ---
    BL = 512
    x_big = jax.random.normal(k_big, (BL, RSA_DIM), dtype=jnp.float32)
    values_big = jax.block_until_ready(
        critic_head_forward(x_big, w1, b1, w2, b2, block_b=256))
    assert values_big.shape == (BL,)
    assert jnp.allclose(values_big, reference(x_big), atol=1e-3, rtol=1e-3)

    print("KERNEL_OK")
</pallas_src>

<mosaic_0001>
module attributes {stable_mosaic.version = 11 : i64} {
  func.func @_critic_head_kernel(%arg0: memref<8x320xf32, #tpu.memory_space<vmem>>, %arg1: memref<320x64xf32, #tpu.memory_space<vmem>>, %arg2: memref<1x64xf32, #tpu.memory_space<vmem>>, %arg3: memref<1x64xf32, #tpu.memory_space<vmem>>, %arg4: memref<1xf32, #tpu.memory_space<smem>>, %arg5: memref<1x8xf32, #tpu.memory_space<vmem>>) attributes {dimension_semantics = [], scalar_prefetch = 0 : i64, scratch_operands = 0 : i64, tpu.core_type = #tpu.core_type<tc>} {
    %c0 = arith.constant 0 : index
    %c0_0 = arith.constant 0 : index
    %0 = vector.load %arg0[%c0, %c0_0] : memref<8x320xf32, #tpu.memory_space<vmem>>, vector<8x320xf32>
    %c0_1 = arith.constant 0 : index
    %c0_2 = arith.constant 0 : index
    %1 = vector.load %arg1[%c0_1, %c0_2] : memref<320x64xf32, #tpu.memory_space<vmem>>, vector<320x64xf32>
    %cst = arith.constant dense<0.000000e+00> : vector<8x64xf32>
    %2 = tpu.matmul %0, %1, %cst {dimension_numbers = #tpu.dot_dimension_numbers<[1], [0], [0], [1], [0, 0, 1, 1], [], []>} : vector<8x320xf32>, vector<320x64xf32>, vector<8x64xf32> -> vector<8x64xf32>
    %c0_3 = arith.constant 0 : index
    %c0_4 = arith.constant 0 : index
    %3 = vector.load %arg2[%c0_3, %c0_4] : memref<1x64xf32, #tpu.memory_space<vmem>>, vector<1x64xf32>
    %4 = vector.broadcast %3 : vector<1x64xf32> to vector<8x64xf32>
    %5 = arith.addf %2, %4 : vector<8x64xf32>
    %cst_5 = arith.constant 0.000000e+00 : f32
    %6 = vector.broadcast %cst_5 : f32 to vector<8x64xf32>
    %7 = arith.maximumf %5, %6 : vector<8x64xf32>
    %c0_6 = arith.constant 0 : index
    %c0_7 = arith.constant 0 : index
    %8 = vector.load %arg3[%c0_6, %c0_7] : memref<1x64xf32, #tpu.memory_space<vmem>>, vector<1x64xf32>
    %cst_8 = arith.constant dense<0.000000e+00> : vector<1x8xf32>
    %9 = tpu.matmul %8, %7, %cst_8 {dimension_numbers = #tpu.dot_dimension_numbers<[1], [1], [0], [0], [0, 0, 1, 0], [], []>} : vector<1x64xf32>, vector<8x64xf32>, vector<1x8xf32> -> vector<1x8xf32>
    %c0_9 = arith.constant 0 : index
    %10 = memref.load %arg4[%c0_9] : memref<1xf32, #tpu.memory_space<smem>>
    %11 = vector.broadcast %10 : f32 to vector<1x8xf32>
    %12 = arith.addf %9, %11 : vector<1x8xf32>
    %c0_10 = arith.constant 0 : index
    %c0_11 = arith.constant 0 : index
    %13 = vector.load %arg5[%c0_10, %c0_11] : memref<1x8xf32, #tpu.memory_space<vmem>>, vector<1x8xf32>
    tpu.vector_store %arg5[%c0_10, %c0_11], %12 {strides = array<i32>} : memref<1x8xf32, #tpu.memory_space<vmem>>, vector<1x8xf32>,
    return
  }
}

</mosaic_0001>

<bundles_post_ra>
// kernel: tpu_custom_call.1
= control target key start
LH: loop header
LB: loop body
LE: loop exit
PB: predicated region body
PF: predicated region fallthrough
CT: control target
= control target key end

     0   :  { %v458_v7 = vmov 0.0|0.0   ;;  %vm459_vm0 = vmmov 0   ;;  %v460_v8 = vmov 0.0   ;;  %s654_s0 = inlined_call_operand.vmem [shape: f32[8,320], index: 0, kind: input, shape index: {}]   ;;  %s655_s1 = inlined_call_operand.vmem [shape: f32[320,64], index: 1, kind: input, shape index: {}]   ;;  %s656_s2 = inlined_call_operand.vmem [shape: f32[1,64], index: 2, kind: input, shape index: {}]   ;;  %s657_s3 = inlined_call_operand.vmem [shape: f32[1,64], index: 3, kind: input, shape index: {}]   ;;  %s658_s4 = inlined_call_operand.<no memory space> [shape: f32[1], index: 4, kind: input, shape index: {}]   ;;  %s659_s5 = inlined_call_operand.hbm [shape: f32[1,8], index: 5, kind: output, shape index: {}]  }
   0x1   :  { %v41_v0 = vld [vmem:[%s655_s1 + $0x80] sm:$0xff]  ;;  %v42_v1 = vld [vmem:[%s655_s1 + $0x88] sm:$0xff]  ;;  %v43_v5 = vld [vmem:[%s655_s1 + $0x90] sm:$0xff]  ;;  %418 = vmatprep.subr.bf16.mxu1 %v458_v7  ;;  %378 = vmatprep.mubr.msk.f32.mxu1 %vm459_vm0, %v460_v8 }
   0x2   :  { %v25_v2 = vld [vmem:[%s655_s1] sm:$0xff]  ;;  %v386_v3 = vpack.c.bf16 %v42_v1, %v41_v0  ;;  %v26_v4 = vld [vmem:[%s655_s1 + $0x8] sm:$0xff]  ;;  %v44_v6 = vld [vmem:[%s655_s1 + $0x98] sm:$0xff] }
   0x3   :  { %v388_v9 = vpack.c.bf16 %v26_v4, %v25_v2  ;;  %v390_v10 = vpack.c.bf16 %v44_v6, %v43_v5  ;;  %v27_v11 = vld [vmem:[%s655_s1 + $0x10] sm:$0xff]  ;;  %v28_v12 = vld [vmem:[%s655_s1 + $0x18] sm:$0xff]  ;;  %v45_v13 = vld [vmem:[%s655_s1 + $0xa0] sm:$0xff] }
   0x4   :  { %387 = vmatprep.subr.bf16.mxu0 %v386_v3  ;;  %v46_v14 = vld [vmem:[%s655_s1 + $0xa8] sm:$0xff]  ;;  %v392_v15 = vpack.c.bf16 %v28_v12, %v27_v11  ;;  %v29_v17 = vld [vmem:[%s655_s1 + $0x20] sm:$0xff]  ;;  %v47_v19 = vld [vmem:[%s655_s1 + $0xb0] sm:$0xff] }
   0x5   :  { %389 = vmatpush3.bf16.msra.mxu0 %v388_v9  ;;  %v394_v16 = vpack.c.bf16 %v46_v14, %v45_v13  ;;  %v30_v18 = vld [vmem:[%s655_s1 + $0x28] sm:$0xff]  ;;  %v48_v20 = vld [vmem:[%s655_s1 + $0xb8] sm:$0xff]  ;;  %v57_v22 = vld [vmem:[%s655_s1 + $0x100] sm:$0xff] }
   0x6   :  { %391 = vmatprep.subr.bf16.mxu0 %v390_v10  ;;  %v396_v21 = vpack.c.bf16 %v30_v18, %v29_v17  ;;  %v58_v23 = vld [vmem:[%s655_s1 + $0x108] sm:$0xff]  ;;  %v398_v24 = vpack.c.bf16 %v48_v20, %v47_v19  ;;  %v31_v25 = vld [vmem:[%s655_s1 + $0x30] sm:$0xff]  ;;  %v32_v26 = vld [vmem:[%s655_s1 + $0x38] sm:$0xff] }
   0x7   :  { %v49_v27 = vld [vmem:[%s655_s1 + $0xc0] sm:$0xff]  ;;  %v419_v28 = vpack.c.bf16 %v58_v23, %v57_v22  ;;  %v50_v29 = vld [vmem:[%s655_s1 + $0xc8] sm:$0xff]  ;;  %v59_v30 = vld [vmem:[%s655_s1 + $0x110] sm:$0xff]  ;;  %v400_v33 = vpack.c.bf16 %v32_v26, %v31_v25 }
   0x8   :  { %v60_v31 = vld [vmem:[%s655_s1 + $0x118] sm:$0xff]  ;;  %v61_v34 = vld [vmem:[%s655_s1 + $0x120] sm:$0xff]  ;;  %v62_v35 = vld [vmem:[%s655_s1 + $0x128] sm:$0xff]  ;;  %v402_v37 = vpack.c.bf16 %v50_v29, %v49_v27 }
   0x9   :  { %393 = vmatpush3.bf16.msra.mxu0 %v392_v15  ;;  %420 = vmatpush3.bf16.msra.mxu1 %v419_v28  ;;  %v422_v32 = vpack.c.bf16 %v60_v31, %v59_v30  ;;  %v23_v36 = vld [vmem:[%s654_s0 + $0x8] sm:$0xff]  ;;  %v33_v38 = vld [vmem:[%s655_s1 + $0x40] sm:$0xff]  ;;  %v51_v40 = vld [vmem:[%s655_s1 + $0xd0] sm:$0xff] }
   0xa   :  { %395 = vmatprep.subr.bf16.mxu0 %v394_v16  ;;  %421 = vmatprep.subr.bf16.mxu1 %v458_v7  ;;  %v34_v39 = vld [vmem:[%s655_s1 + $0x48] sm:$0xff]  ;;  %v52_v41 = vld [vmem:[%s655_s1 + $0xd8] sm:$0xff] }
   0xb   :  { %140 = vmatprep.mubr.f32.mxu0 %v23_v36 }
   0xd   :  { %397 = vmatpush3.bf16.msra.mxu0 %v396_v21 }
   0xe   :  { %399 = vmatprep.subr.bf16.mxu0 %v398_v24 }
   0xf   :  { %11 = vsyncpa [#allocation4], 0  ;;  %423 = vmatpush3.bf16.msra.mxu1 %v422_v32  ;;  %v425_v42 = vpack.c.bf16 %v62_v35, %v61_v34  ;;  %v404_v43 = vpack.c.bf16 %v34_v39, %v33_v38  ;;  %v63_v44 = vld [vmem:[%s655_s1 + $0x130] sm:$0xff]  ;;  %v64_v45 = vld [vmem:[%s655_s1 + $0x138] sm:$0xff]  ;;  %v406_v46 = vpack.c.bf16 %v52_v41, %v51_v40  ;;  %vm72_vm1 = vcmask 523264   ;;  %s461_s8 = smov [#allocation3]  }
  0x10   :  { %424 = vmatprep.subr.bf16.mxu1 %v458_v7  ;;  %v35_v47 = vld [vmem:[%s655_s1 + $0x50] sm:$0xff]  ;;  %v36_v48 = vld [vmem:[%s655_s1 + $0x58] sm:$0xff]  ;;  %v53_v49 = vld [vmem:[%s655_s1 + $0xe0] sm:$0xff]  ;;  %v428_v51 = vpack.c.bf16 %v64_v45, %v63_v44  ;;  %v219_v11 = vstv %s658_s4  ;;  %s304_s9 = sshll.u32 %s461_s8, 4  ;;  %vm296_vm2 = vcmask 57344   ;;  %s305_s9 = int_to_ptr.vmem [resolvable:$true] %s304_s9 }
  0x11   :  { %401 = vmatpush3.bf16.msra.mxu0 %v400_v33  ;;  %v54_v50 = vld [vmem:[%s655_s1 + $0xe8] sm:$0xff]  ;;  %v408_v52 = vpack.c.bf16 %v36_v48, %v35_v47  ;;  %v37_v54 = vld [vmem:[%s655_s1 + $0x60] sm:$0xff]  ;;  %v55_v56 = vld [vmem:[%s655_s1 + $0xf0] sm:$0xff]  ;;  %s438_s10 = scalar_lea.vmem %s305_s9, 32  ;;  %p439_p1 = scmp.lt.s32.totalorder %s305_s9, %s305_s9 }
  0x12   :  { %403 = vmatprep.subr.bf16.mxu0 %v402_v37  ;;  %v410_v53 = vpack.c.bf16 %v54_v50, %v53_v49  ;;  %v38_v55 = vld [vmem:[%s655_s1 + $0x68] sm:$0xff]  ;;  %v56_v57 = vld [vmem:[%s655_s1 + $0xf8] sm:$0xff]  ;;  %v24_v58 = vld [vmem:[%s654_s0 + $0x10] sm:$0xff] }
  0x13   :  { %426 = vmatpush3.bf16.msra.mxu1 %v425_v42  ;;  %v412_v59 = vpack.c.bf16 %v38_v55, %v37_v54  ;;  %v414_v60 = vpack.c.bf16 %v56_v57, %v55_v56  ;;  %v39_v61 = vld [vmem:[%s655_s1 + $0x70] sm:$0xff]  ;;  %v40_v62 = vld [vmem:[%s655_s1 + $0x78] sm:$0xff]  ;;  %v22_v0 = vld [vmem:[%s654_s0] sm:$0xff] }
  0x14   :  { %427 = vmatprep.subr.bf16.mxu1 %v458_v7  ;;  %v416_v63 = vpack.c.bf16 %v40_v62, %v39_v61  ;;  %v312_v5 = vld [vmem:[%s656_s2] ss:$0 sm:$0xff]  ;;  %s434_s2 = scalar_lea.vmem %s305_s9, 16 }
  0x15   :  { %405 = vmatpush3.bf16.msra.mxu0 %v404_v43  ;;  %v217_v10 = vld [vmem:[%s657_s3] sm:$0x1]  ;;  %p435_p0 = scmp.ne.s32.totalorder %s305_s9, %s434_s2  ;;  %p440_p2 = scmp.lt.s32.totalorder %s438_s10, %s434_s2 }
  0x16   :  { %407 = vmatprep.subr.bf16.mxu0 %v406_v46 }
  0x17   :  { %429 = vmatpush3.bf16.msra.mxu1 %v428_v51  ;;  %p441_p3 = por %p440_p2, %p439_p1 }
  0x18   :  { %381 = vmatprep.subr.mxu1 %v460_v8 }
  0x19   :  { %409 = vmatpush3.bf16.msra.mxu0 %v408_v52  ;;  %p442_p4 = pnand %p441_p3, %p435_p0 }
  0x1a   :  { %411 = vmatprep.subr.bf16.mxu0 %v410_v53  ;;  %379 = vmatmul.mubr.msk.f32.vlgmr.msra.gmra.mrb[0].mxu1 %vm72_vm1, %v24_v58 }
  0x1b   :  { %383 = vmatprep.mubr.msk.f32.mxu1 %vm459_vm0, %v460_v8 }
  0x1d   :  { %413 = vmatpush3.bf16.msra.mxu0 %v412_v59 }
  0x1e   :  { %415 = vmatprep.subr.bf16.mxu0 %v414_v60 }
  0x21   :  { %417 = vmatpush3.bf16.msra.mxu0 %v416_v63 }
  0x24   :  { %141 = vmatmul.mubr.f32.vlgmr.msra.gmra.mrb[0].mxu0 %v22_v0 }
  0xed   :  { %v212_v1 = vpop.f32.mrb[0].mxu1 }
  0xee   :  { %v380_v2 = vpop.f32.mrb[1].mxu1 }
  0xf7   :  { %v348_v3 = vpop.f32.mrb[0].mxu0 }
  0xf8   :  { %v349_v4 = vpop.f32.mrb[1].mxu0 }
  0xf9   :  { %v350_v6 = vadd.f32 %v349_v4, %v348_v3 }
  0xfb   :  { %v143_v7 = vadd.f32 %v350_v6, %v312_v5 }
  0xfd   :  { %v213_v8 = vadd.f32 %v212_v1, %v143_v7 }
  0xff   :  { %v216_v9 = vmax.f32 %v213_v8, 0.0 }
 0x101   :  { %382 = vmatpush3.xpose.msk.msra.mxu1 %vm72_vm1, %v216_v9 }
 0x104   :  { %384 = vmatmul.mubr.msk.f32.vlgmr.msra.gmra.mrb[2].mxu1 %vm72_vm1, %v217_v10 }
 0x1d7   :  { %v292_v12 = vpop.f32.mrb[2].mxu1 }
 0x1d8   :  { %v293_v13 = vadd.f32 %v292_v12, %v219_v11  ;;  %v385_v14 = vpop.f32.mrb[3].mxu1 }
 0x1da   :  { %297 = vst.msk [vmem:[#allocation3] sm:$0x1] %vm296_vm2, %v293_v13 }
 0x1db   :  { %445 = shalt.err (!%p442_p4)
}
 0x1dc   :  { %s446_s4 = scalar_lea.hbm %s659_s5, 16 }
 0x1dd   :  { %p447_p5 = scmp.ne.s32.totalorder %s659_s5, %s446_s4  ;;  %p450_p6 = scmp.lt.u32.totalorder %s446_s4, %s659_s5 }
 0x1df   :  { %p452_p7 = pnand %p450_p6, %p447_p5 }
 0x1e1   :  { %455 = shalt.err (!%p452_p7)
}
 0x1e2   :  { %307 = dma.vmem_to_hbm [thread:$0]  %s305_s9, 16, %s659_s5, [#allocation4]  }
 0x1e3   :  { %456 = dma.done.wait [#allocation4], 16  }
 0x1e4   :  { %457 = vsyncadd [#allocation4], 4294967280 }
 0x1e5   :  { %311 = vsyncpa [#allocation4], 1 }

</bundles_post_ra>
